<compile_context>
chip_gen: v5e
topology: v5e:2x2
jax: 0.10.0
libtpu: 0.0.40
codegen_flags: <defaults>
</compile_context>

<pallas_src>
import jax
import jax.numpy as jnp
from jax.experimental import pallas as pl
from jax.experimental.pallas import tpu as pltpu

_VMEM_LIMIT = 48 * 1024 * 1024       # safe on v7x (64 MiB/TC); fine on v5e/v6e
_RESIDENT_BUDGET = 24 * 1024 * 1024  # max bytes (incl. double buffer) for a resident slab


def _round_up(x, m):
    return (x + m - 1) // m * m


# --------------------------------------------------------------------------
# Kernels
# --------------------------------------------------------------------------
def support_kernel(x_ref, w1_ref, s_ref):
    # support1 = x @ W1  (bf16 operands, f32 MXU accumulate, bf16 store)
    s_ref[...] = jnp.dot(x_ref[...], w1_ref[...],
                         preferred_element_type=jnp.float32).astype(s_ref.dtype)


def make_gcn1_kernel(resident, t):
    # hidden1 = relu(adj @ support1); adj-K accumulated in an f32 VMEM scratch.
    def kernel(adj_ref, s_ref, h_ref, acc_ref):
        k = pl.program_id(1)

        @pl.when(k == 0)
        def _():
            acc_ref[...] = jnp.zeros_like(acc_ref)

        if resident:
            # support1 held fully resident in VMEM; slice the current K tile.
            s_blk = s_ref[pl.ds(pl.multiple_of(k * t, t), t), :]
        else:
            s_blk = s_ref[...]
        acc_ref[...] += jnp.dot(adj_ref[...], s_blk,
                                preferred_element_type=jnp.float32)

        @pl.when(k == pl.num_programs(1) - 1)
        def _():
            h_ref[...] = jnp.maximum(acc_ref[...], 0.0).astype(h_ref.dtype)

    return kernel


def make_gcn2_kernel(resident, t, h2_pad):
    # acc = adj @ hidden1 over K tiles; epilogue applies the (re-associated)
    # weight multiply: [mu | logvar] = acc @ [W2 | W3], and z = mu in bf16.
    def kernel(adj_ref, h_ref, w23_ref, mulv_ref, z_ref, acc_ref):
        k = pl.program_id(1)

        @pl.when(k == 0)
        def _():
            acc_ref[...] = jnp.zeros_like(acc_ref)

        if resident:
            h_blk = h_ref[pl.ds(pl.multiple_of(k * t, t), t), :]
        else:
            h_blk = h_ref[...]
        acc_ref[...] += jnp.dot(adj_ref[...], h_blk,
                                preferred_element_type=jnp.float32)

        @pl.when(k == pl.num_programs(1) - 1)
        def _():
            out = jnp.dot(acc_ref[...], w23_ref[...],
                          preferred_element_type=jnp.float32)
            mulv_ref[...] = out
            z_ref[...] = out[:, :h2_pad].astype(z_ref.dtype)

    return kernel


def decoder_kernel(zi_ref, zt_ref, pred_ref):
    # pred[i, j] = z_i @ z^T[:, j]  — plain MXU matmul, RHS already transposed.
    pred_ref[...] = jnp.dot(zi_ref[...], zt_ref[...],
                            preferred_element_type=jnp.float32)


# --------------------------------------------------------------------------
# Wrapper
# --------------------------------------------------------------------------
def gcn_vae_forward(x, adj, w1, w2, w3, *, tile=512):
    """Eval-mode VGAE forward. Returns (pred_adj [n,n], mu [n,h2], logvar [n,h2])."""
    f32, bf16 = jnp.float32, jnp.bfloat16
    n, f = x.shape
    h1 = w1.shape[1]
    h2 = w2.shape[1]

    f_pad = _round_up(f, 128)
    h1_pad = _round_up(h1, 128)
    h2_pad = _round_up(h2, 128)

    # Row/K tile: multiple of 128; cap at half the (128-padded) node count so a
    # v7x megacore gets at least two tiles on the "parallel" row axis.
    tile = max(tile, 128)
    n128 = _round_up(n, 128)
    t = min(tile, n128)
    if n128 >= 256:
        t = min(t, _round_up(n128 // 2, 128))
    n_pad = _round_up(n, t)
    nt = n_pad // t

    # Stage A's per-step footprint is tiny -> use a bigger row tile there.
    ta = t
    while ta * 2 <= 2048 and n_pad % (ta * 2) == 0:
        ta *= 2

    # bf16 operands for all large MXU streams (f32 accumulation in-kernel).
    # Zero padding is exact: relu(0)=0 and zero rows/cols contribute nothing.
    xp = jnp.pad(x.astype(bf16), ((0, n_pad - n), (0, f_pad - f)))
    adjp = jnp.pad(adj.astype(bf16), ((0, n_pad - n), (0, n_pad - n)))
    w1p = jnp.pad(w1.astype(bf16), ((0, f_pad - f), (0, h1_pad - h1)))
    w2p = jnp.pad(w2.astype(f32), ((0, h1_pad - h1), (0, h2_pad - h2)))
    w3p = jnp.pad(w3.astype(f32), ((0, h1_pad - h1), (0, h2_pad - h2)))
    w23 = jnp.concatenate([w2p, w3p], axis=1)    # [h1_pad, 2*h2_pad], f32, lane-dense

    # Hold the re-streamed (n_pad, h1_pad) bf16 slab fully resident in VMEM
    # when it fits a v7x-safe budget (2x for Pallas' default double buffer).
    slab_bytes = 2 * (n_pad * h1_pad * 2)
    resident = slab_bytes <= _RESIDENT_BUDGET

    # ---- Stage A: support1 = x @ W1 -----------------------------------------
    support1 = pl.pallas_call(
        support_kernel,
        out_shape=jax.ShapeDtypeStruct((n_pad, h1_pad), bf16),
        grid_spec=pltpu.PrefetchScalarGridSpec(
            num_scalar_prefetch=0,
            grid=(n_pad // ta,),
            in_specs=[pl.BlockSpec((ta, f_pad), lambda i: (i, 0)),
                      pl.BlockSpec((f_pad, h1_pad), lambda i: (0, 0))],
            out_specs=pl.BlockSpec((ta, h1_pad), lambda i: (i, 0)),
        ),
        compiler_params=pltpu.CompilerParams(
            dimension_semantics=("parallel",),
            vmem_limit_bytes=_VMEM_LIMIT),
        cost_estimate=pl.CostEstimate(
            flops=2 * n_pad * f_pad * h1_pad,
            transcendentals=0,
            bytes_accessed=2 * (n_pad * f_pad + f_pad * h1_pad + n_pad * h1_pad)),
    )(xp, w1p)

    # ---- Stage B: hidden1 = relu(adj @ support1) -----------------------------
    if resident:
        s_spec = pl.BlockSpec((n_pad, h1_pad), lambda i, k: (0, 0))
    else:
        s_spec = pl.BlockSpec((t, h1_pad), lambda i, k: (k, 0))

    hidden1 = pl.pallas_call(
        make_gcn1_kernel(resident, t),
        out_shape=jax.ShapeDtypeStruct((n_pad, h1_pad), bf16),
        grid_spec=pltpu.PrefetchScalarGridSpec(
            num_scalar_prefetch=0,
            grid=(nt, nt),
            in_specs=[pl.BlockSpec((t, t), lambda i, k: (i, k)), s_spec],
            out_specs=pl.BlockSpec((t, h1_pad), lambda i, k: (i, 0)),
            scratch_shapes=[pltpu.VMEM((t, h1_pad), f32)],
        ),
        compiler_params=pltpu.CompilerParams(
            dimension_semantics=("parallel", "arbitrary"),
            vmem_limit_bytes=_VMEM_LIMIT),
        cost_estimate=pl.CostEstimate(
            flops=2 * n_pad * n_pad * h1_pad,
            transcendentals=0,
            bytes_accessed=2 * n_pad * n_pad
            + (1 if resident else nt) * n_pad * h1_pad * 2
            + n_pad * h1_pad * 2),
    )(adjp, support1)

    # ---- Stage C: [mu|logvar] = (adj @ hidden1) @ [W2|W3], z = mu (bf16) -----
    if resident:
        h_spec = pl.BlockSpec((n_pad, h1_pad), lambda i, k: (0, 0))
    else:
        h_spec = pl.BlockSpec((t, h1_pad), lambda i, k: (k, 0))

    mulv, z_bf16 = pl.pallas_call(
        make_gcn2_kernel(resident, t, h2_pad),
        out_shape=(jax.ShapeDtypeStruct((n_pad, 2 * h2_pad), f32),
                   jax.ShapeDtypeStruct((n_pad, h2_pad), bf16)),
        grid_spec=pltpu.PrefetchScalarGridSpec(
            num_scalar_prefetch=0,
            grid=(nt, nt),
            in_specs=[pl.BlockSpec((t, t), lambda i, k: (i, k)),
                      h_spec,
                      pl.BlockSpec((h1_pad, 2 * h2_pad), lambda i, k: (0, 0))],
            out_specs=[pl.BlockSpec((t, 2 * h2_pad), lambda i, k: (i, 0)),
                       pl.BlockSpec((t, h2_pad), lambda i, k: (i, 0))],
            scratch_shapes=[pltpu.VMEM((t, h1_pad), f32)],
        ),
        compiler_params=pltpu.CompilerParams(
            dimension_semantics=("parallel", "arbitrary"),
            vmem_limit_bytes=_VMEM_LIMIT),
        cost_estimate=pl.CostEstimate(
            flops=2 * n_pad * n_pad * h1_pad + 2 * n_pad * h1_pad * 2 * h2_pad,
            transcendentals=0,
            bytes_accessed=2 * n_pad * n_pad
            + (1 if resident else nt) * n_pad * h1_pad * 2
            + n_pad * 2 * h2_pad * 4 + n_pad * h2_pad * 2),
    )(adjp, hidden1, w23)

    # ---- Stage D: pred_adj = z @ z.T (z = mu in eval mode) -------------------
    zt = z_bf16.T  # (h2_pad, n_pad) bf16 — tiny; avoids per-tile XLU transposes

    pred_pad = pl.pallas_call(
        decoder_kernel,
        out_shape=jax.ShapeDtypeStruct((n_pad, n_pad), f32),
        grid_spec=pltpu.PrefetchScalarGridSpec(
            num_scalar_prefetch=0,
            grid=(nt, nt),
            in_specs=[pl.BlockSpec((t, h2_pad), lambda i, j: (i, 0)),
                      pl.BlockSpec((h2_pad, t), lambda i, j: (0, j))],
            out_specs=pl.BlockSpec((t, t), lambda i, j: (i, j)),
        ),
        compiler_params=pltpu.CompilerParams(
            dimension_semantics=("parallel", "parallel"),
            vmem_limit_bytes=_VMEM_LIMIT),
        cost_estimate=pl.CostEstimate(
            flops=2 * n_pad * n_pad * h2_pad,
            transcendentals=0,
            bytes_accessed=n_pad * n_pad * 4
            + n_pad * h2_pad * 2 + nt * n_pad * h2_pad * 2),
    )(z_bf16, zt)

    mu = mulv[:n, :h2]
    logvar = mulv[:n, h2_pad:h2_pad + h2]
    return pred_pad[:n, :n], mu, logvar


# --------------------------------------------------------------------------
# Reference + demo
# --------------------------------------------------------------------------
def _reference(x, adj, w1, w2, w3):
    # Same math as the module's eval forward (hidden1 = relu(adj@(x@W1)),
    # mu/logvar = adj@hidden1@W, z = mu, pred = z@z.T), with the kernel's
    # mixed precision mirrored (bf16 MXU operands, f32 accumulation).
    f32, bf16 = jnp.float32, jnp.bfloat16
    s1 = jnp.dot(x.astype(bf16), w1.astype(bf16),
                 preferred_element_type=f32).astype(bf16)
    hidden1 = jnp.maximum(
        jnp.dot(adj.astype(bf16), s1, preferred_element_type=f32), 0.0).astype(bf16)
    ah = jnp.dot(adj.astype(bf16), hidden1, preferred_element_type=f32)
    mu = jnp.dot(ah, w2.astype(f32), preferred_element_type=f32)
    logvar = jnp.dot(ah, w3.astype(f32), preferred_element_type=f32)
    z = mu.astype(bf16)
    pred = jnp.dot(z, z.T, preferred_element_type=f32)
    return pred, mu, logvar


if __name__ == "__main__":
    # Small, module-consistent shapes.
    n_nodes = 16
    input_feat_dim = 32
    hidden_dim1 = 32
    hidden_dim2 = 16

    key = jax.random.PRNGKey(0)
    kx, kadj, k1, k2, k3 = jax.random.split(key, 5)

    # Node features.
    x = jax.random.normal(kx, (n_nodes, input_feat_dim), dtype=jnp.float32)

    # Dense symmetric normalized adjacency (D^-1/2 (A+I) D^-1/2).
    a = (jax.random.uniform(kadj, (n_nodes, n_nodes)) > 0.7).astype(jnp.float32)
    a = jnp.maximum(a, a.T)
    a = a.at[jnp.arange(n_nodes), jnp.arange(n_nodes)].set(1.0)
    deg = jnp.sum(a, axis=1)
    d_inv_sqrt = 1.0 / jnp.sqrt(deg)
    adj = a * d_inv_sqrt[:, None] * d_inv_sqrt[None, :]

    # Deterministic glorot-uniform weights (matches the GCN layer shapes).
    def glorot(k, fan_in, fan_out):
        limit = jnp.sqrt(6.0 / (fan_in + fan_out))
        return jax.random.uniform(k, (fan_in, fan_out), jnp.float32,
                                  -limit, limit)

    w1 = glorot(k1, input_feat_dim, hidden_dim1)
    w2 = glorot(k2, hidden_dim1, hidden_dim2)
    w3 = glorot(k3, hidden_dim1, hidden_dim2)

    pred_adj, mu, logvar = gcn_vae_forward(x, adj, w1, w2, w3)
    jax.block_until_ready((pred_adj, mu, logvar))

    # Sanity check against a precision-matched pure-JAX reference (bf16 MXU
    # operands change rounding vs. a pure-f32 reference, so tolerances are
    # set for bf16-level agreement).
    ref_pred, ref_mu, ref_logvar = _reference(x, adj, w1, w2, w3)
    assert pred_adj.shape == (n_nodes, n_nodes)
    assert mu.shape == (n_nodes, hidden_dim2)
    assert logvar.shape == (n_nodes, hidden_dim2)
    assert jnp.allclose(mu, ref_mu, atol=5e-2, rtol=5e-2)
    assert jnp.allclose(logvar, ref_logvar, atol=5e-2, rtol=5e-2)
    assert jnp.allclose(pred_adj, ref_pred, atol=5e-2, rtol=5e-2)

    print("KERNEL_OK")
</pallas_src>

<mosaic_0001>
module attributes {stable_mosaic.version = 11 : i64} {
  func.func @support_kernel(%arg0: i32, %arg1: memref<128x128xbf16, #tpu.memory_space<vmem>>, %arg2: memref<128x128xbf16, #tpu.memory_space<vmem>>, %arg3: memref<128x128xbf16, #tpu.memory_space<vmem>>) attributes {dimension_semantics = [#tpu.dimension_semantics<parallel>], iteration_bounds = array<i64: 1>, scalar_prefetch = 0 : i64, scratch_operands = 0 : i64, tpu.core_type = #tpu.core_type<tc>, window_params = [{transform_indices = @transform_0, window_bounds = array<i64: 128, 128>}, {pipeline_mode = #tpu.pipeline_mode<synchronous>, transform_indices = @transform_1, window_bounds = array<i64: 128, 128>}, {transform_indices = @transform_2, window_bounds = array<i64: 128, 128>}]} {
    %c0 = arith.constant 0 : index
    %c0_0 = arith.constant 0 : index
    %0 = vector.load %arg1[%c0, %c0_0] : memref<128x128xbf16, #tpu.memory_space<vmem>>, vector<128x128xbf16>
    %c0_1 = arith.constant 0 : index
    %c0_2 = arith.constant 0 : index
    %1 = vector.load %arg2[%c0_1, %c0_2] : memref<128x128xbf16, #tpu.memory_space<vmem>>, vector<128x128xbf16>
    %cst = arith.constant dense<0.000000e+00> : vector<128x128xf32>
    %2 = tpu.matmul %0, %1, %cst {dimension_numbers = #tpu.dot_dimension_numbers<[1], [0], [0], [1], [0, 0, 1, 1], [], []>} : vector<128x128xbf16>, vector<128x128xbf16>, vector<128x128xf32> -> vector<128x128xf32>
    %3 = arith.truncf %2 : vector<128x128xf32> to vector<128x128xbf16>
    %c0_3 = arith.constant 0 : index
    %c0_4 = arith.constant 0 : index
    %4 = vector.load %arg3[%c0_3, %c0_4] : memref<128x128xbf16, #tpu.memory_space<vmem>>, vector<128x128xbf16>
    tpu.vector_store %arg3[%c0_3, %c0_4], %3 {strides = array<i32>} : memref<128x128xbf16, #tpu.memory_space<vmem>>, vector<128x128xbf16>,
    return
  }
  func.func @transform_0(%arg0: i32) -> (i32, i32) {
    %c0_i32 = arith.constant 0 : i32
    %c0_i32_0 = arith.constant 0 : i32
    return %arg0, %c0_i32 : i32, i32
  }
  func.func @transform_1(%arg0: i32) -> (i32, i32) {
    %c0_i32 = arith.constant 0 : i32
    %c0_i32_0 = arith.constant 0 : i32
    %c0_i32_1 = arith.constant 0 : i32
    return %c0_i32, %c0_i32_0 : i32, i32
  }
  func.func @transform_2(%arg0: i32) -> (i32, i32) {
    %c0_i32 = arith.constant 0 : i32
    %c0_i32_0 = arith.constant 0 : i32
    return %arg0, %c0_i32 : i32, i32
  }
}

</mosaic_0001>

<bundles_post_ra>
// kernel: tpu_custom_call.1
= control target key start
LH: loop header
LB: loop body
LE: loop exit
PB: predicated region body
PF: predicated region fallthrough
CT: control target
= control target key end

     0   :  { %7 = vsyncpa [#allocation3], 0  ;;  %s545_s0 = inlined_call_operand.hbm [shape: bf16[128,128], index: 0, kind: input, shape index: {}]   ;;  %s546_s1 = inlined_call_operand.hbm [shape: bf16[128,128], index: 1, kind: input, shape index: {}]   ;;  %s547_s2 = inlined_call_operand.hbm [shape: bf16[128,128], index: 2, kind: output, shape index: {}]  }
   0x1   :  { %8 = vsyncpa [#allocation6], 0 }
   0x2   :  { %9 = vsyncpa [#allocation4], 0  ;;  %s14_s11 = sshll.u32 %s545_s0, 4  ;;  %s507_s12 = smov [#allocation2]   ;;  %s15_s11 = int_to_ptr.hbm [resolvable:$true] %s14_s11 }
   0x3   :  { %s16_s13 = sshll.u32 %s507_s12, 4  ;;  %s27_s16 = sshll.u32 %s546_s1, 4  ;;  %s17_s13 = int_to_ptr.vmem [resolvable:$true] %s16_s13  ;;  %s28_s16 = int_to_ptr.hbm [resolvable:$true] %s27_s16 }
   0x4   :  { %s508_s17 = smov 64   ;;  %s509_s18 = smov 4  }
   0x5   :  { %22 = dma.hbm_to_vmem [thread:$0]  %s15_s11, 1024, %s17_s13, [#allocation3], %s508_s17, %s508_s17, %s509_s18  }
   0x6   :  { %s510_s19 = smov [#allocation5]  }
   0x7   :  { %s29_s20 = sshll.u32 %s510_s19, 4  ;;  %s30_s20 = int_to_ptr.vmem [resolvable:$true] %s29_s20 }
   0x8   :  { %35 = dma.hbm_to_vmem [thread:$0]  %s28_s16, 1024, %s30_s20, [#allocation6], %s508_s17, %s508_s17, %s509_s18  }
   0x9   :  { %501 = dma.done.wait [#allocation3], 1024  }
   0xa   :  { %502 = vsyncadd [#allocation3], 4294966272 }
   0xb   :  { %503 = dma.done.wait [#allocation6], 1024  }
   0xc   :  { %504 = vsyncadd [#allocation6], 4294966272  ;;  %v352_v0 = vld [vmem:[#allocation5 + $0x38] sm:$0xff]  ;;  %v351_v1 = vld [vmem:[#allocation5 + $0x30] sm:$0xff]  ;;  %s511_s0 = smov [#allocation7]   ;;  %s259_s23 = sshll.u32 %s547_s2, 4  ;;  %s260_s23 = int_to_ptr.hbm [resolvable:$true] %s259_s23 }
   0xd   :  { %172 = vmatpush.bf16.msra.mxu0 %v352_v0  ;;  %400 = vmatpush.bf16.msra.mxu1 %v352_v0  ;;  %v350_v2 = vld [vmem:[#allocation5 + $0x28] sm:$0xff]  ;;  %v349_v3 = vld [vmem:[#allocation5 + $0x20] sm:$0xff]  ;;  %v348_v4 = vld [vmem:[#allocation5 + $0x18] sm:$0xff]  ;;  %s257_s1 = sshll.u32 %s511_s0, 4  ;;  %s258_s1 = int_to_ptr.vmem [resolvable:$true] %s257_s1 }
   0xe   :  { %401 = vmatpush.bf16.msra.mxu2 %v352_v0  ;;  %402 = vmatpush.bf16.msra.mxu3 %v352_v0  ;;  %v347_v5 = vld [vmem:[#allocation5 + $0x10] sm:$0xff]  ;;  %v346_v6 = vld [vmem:[#allocation5 + $0x8] sm:$0xff]  ;;  %v345_v7 = vld [vmem:[#allocation5] sm:$0xff] }
   0xf   :  { %v337_v8 = vld [vmem:[#allocation2] sm:$0xff]  ;;  %v339_v9 = vld [vmem:[#allocation2 + $0x10] sm:$0xff]  ;;  %v338_v12 = vld [vmem:[#allocation2 + $0x8] sm:$0xff] }
  0x10   :  { %v341_v10 = vld [vmem:[#allocation2 + $0x20] sm:$0xff]  ;;  %v343_v11 = vld [vmem:[#allocation2 + $0x30] sm:$0xff]  ;;  %v340_v13 = vld [vmem:[#allocation2 + $0x18] sm:$0xff] }
  0x11   :  { %173 = vmatpush.bf16.msra.mxu0 %v351_v1  ;;  %403 = vmatpush.bf16.msra.mxu1 %v351_v1  ;;  %v342_v14 = vld [vmem:[#allocation2 + $0x28] sm:$0xff]  ;;  %v344_v15 = vld [vmem:[#allocation2 + $0x38] sm:$0xff] }
  0x12   :  { %404 = vmatpush.bf16.msra.mxu2 %v351_v1  ;;  %405 = vmatpush.bf16.msra.mxu3 %v351_v1 }
  0x15   :  { %174 = vmatpush.bf16.msra.mxu0 %v350_v2  ;;  %406 = vmatpush.bf16.msra.mxu1 %v350_v2 }
  0x16   :  { %407 = vmatpush.bf16.msra.mxu2 %v350_v2  ;;  %408 = vmatpush.bf16.msra.mxu3 %v350_v2 }
  0x19   :  { %175 = vmatpush.bf16.msra.mxu0 %v349_v3  ;;  %409 = vmatpush.bf16.msra.mxu1 %v349_v3 }
  0x1a   :  { %410 = vmatpush.bf16.msra.mxu2 %v349_v3  ;;  %411 = vmatpush.bf16.msra.mxu3 %v349_v3 }
  0x1d   :  { %176 = vmatpush.bf16.msra.mxu0 %v348_v4  ;;  %412 = vmatpush.bf16.msra.mxu1 %v348_v4 }
  0x1e   :  { %413 = vmatpush.bf16.msra.mxu2 %v348_v4  ;;  %414 = vmatpush.bf16.msra.mxu3 %v348_v4 }
  0x21   :  { %177 = vmatpush.bf16.msra.mxu0 %v347_v5  ;;  %415 = vmatpush.bf16.msra.mxu1 %v347_v5 }
  0x22   :  { %416 = vmatpush.bf16.msra.mxu2 %v347_v5  ;;  %417 = vmatpush.bf16.msra.mxu3 %v347_v5 }
  0x25   :  { %178 = vmatpush.bf16.msra.mxu0 %v346_v6  ;;  %418 = vmatpush.bf16.msra.mxu1 %v346_v6 }
  0x26   :  { %419 = vmatpush.bf16.msra.mxu2 %v346_v6  ;;  %420 = vmatpush.bf16.msra.mxu3 %v346_v6 }
  0x29   :  { %179 = vmatpush.bf16.msra.mxu0 %v345_v7  ;;  %421 = vmatpush.bf16.msra.mxu1 %v345_v7 }
  0x2a   :  { %422 = vmatpush.bf16.msra.mxu2 %v345_v7  ;;  %423 = vmatpush.bf16.msra.mxu3 %v345_v7 }
  0x2c   :  { %180 = vmatmul.bf16.vlgmr.msra.gmra.mxu0 %v337_v8  ;;  %190 = vmatmul.bf16.vlgmr.msra.gmra.mxu1 %v339_v9 }
  0x2d   :  { %200 = vmatmul.bf16.vlgmr.msra.gmra.mxu2 %v341_v10  ;;  %210 = vmatmul.bf16.vlgmr.msra.gmra.mxu3 %v343_v11 }
  0x3c   :  { %185 = vmatmul.bf16.gmra.mxu0 %v338_v12  ;;  %195 = vmatmul.bf16.gmra.mxu1 %v340_v13 }
  0x3d   :  { %205 = vmatmul.bf16.gmra.mxu2 %v342_v14  ;;  %215 = vmatmul.bf16.gmra.mxu3 %v344_v15 }
  0xa9   :  { %v181_v16 = vpop.f32.mrf.mxu0  ;;  %v191_v17 = vpop.f32.mrf.mxu1 }
  0xb0   :  { %v201_v18 = vpop.f32.mrf.mxu2  ;;  %v211_v19 = vpop.f32.mrf.mxu3 }
  0xb1   :  { %v183_v20 = vpop.f32.mrf.mxu0  ;;  %v193_v21 = vpop.f32.mrf.mxu1 }
  0xb2   :  { %v356_v22 = vpack.c.bf16 %v183_v20, %v181_v16  ;;  %v366_v23 = vpack.c.bf16 %v193_v21, %v191_v17 }
  0xb4   :  { %357 = vst [vmem:[#allocation7] sm:$0xff] %v356_v22  }
  0xb5   :  { %394 = vst [vmem:[#allocation7 + $0x10] sm:$0xff] %v366_v23  }
  0xb8   :  { %v203_v24 = vpop.f32.mrf.mxu2  ;;  %v213_v25 = vpop.f32.mrf.mxu3 }
  0xb9   :  { %v376_v26 = vpack.c.bf16 %v203_v24, %v201_v18  ;;  %v386_v27 = vpack.c.bf16 %v213_v25, %v211_v19  ;;  %v186_v28 = vpop.f32.mrf.mxu0  ;;  %v196_v29 = vpop.f32.mrf.mxu1 }
  0xbb   :  { %396 = vst [vmem:[#allocation7 + $0x20] sm:$0xff] %v376_v26  }
  0xbc   :  { %398 = vst [vmem:[#allocation7 + $0x30] sm:$0xff] %v386_v27  }
  0xc0   :  { %v206_v30 = vpop.f32.mrf.mxu2  ;;  %v216_v31 = vpop.f32.mrf.mxu3 }
  0xc1   :  { %v188_v32 = vpop.f32.mrf.mxu0  ;;  %v198_v33 = vpop.f32.mrf.mxu1 }
  0xc2   :  { %v361_v34 = vpack.c.bf16 %v188_v32, %v186_v28  ;;  %v371_v35 = vpack.c.bf16 %v198_v33, %v196_v29 }
  0xc4   :  { %393 = vst [vmem:[#allocation7 + $0x8] sm:$0xff] %v361_v34  }
  0xc5   :  { %395 = vst [vmem:[#allocation7 + $0x18] sm:$0xff] %v371_v35  }
  0xc8   :  { %v208_v36 = vpop.f32.mrf.mxu2  ;;  %v218_v37 = vpop.f32.mrf.mxu3 }
  0xc9   :  { %v381_v38 = vpack.c.bf16 %v208_v36, %v206_v30  ;;  %v391_v39 = vpack.c.bf16 %v218_v37, %v216_v31 }
  0xcb   :  { %397 = vst [vmem:[#allocation7 + $0x28] sm:$0xff] %v381_v38  }
  0xcc   :  { %399 = vst [vmem:[#allocation7 + $0x38] sm:$0xff] %v391_v39  }
  0xcd   :  { %265 = dma.vmem_to_hbm [thread:$0]  %s258_s1, 1024, %s260_s23, [#allocation4], %s508_s17, %s508_s17, %s509_s18  }
  0xce   :  { %505 = dma.done.wait [#allocation4], 1024  }
  0xcf   :  { %506 = vsyncadd [#allocation4], 4294966272 }
  0xd0   :  { %270 = vsyncpa [#allocation3], 1 }
  0xd1   :  { %271 = vsyncpa [#allocation6], 1 }
  0xd2   :  { %272 = vsyncpa [#allocation4], 1 }

</bundles_post_ra>
